<compile_context>
chip_gen: v5e
topology: v5e:2x2
jax: 0.10.0
libtpu: 0.0.40
codegen_flags: <defaults>
</compile_context>

<pallas_src>
import functools

import jax
import jax.numpy as jnp
from jax.experimental import pallas as pl
from jax.experimental.pallas import tpu as pltpu


def make_pe_table(seqn_len: int, d_model: int) -> jnp.ndarray:
    """Reproduces the PyTorch buffer exactly as written: the double loop writes
    pe[pos, j] = cos(pos / 10000 ** (2 * j / d_model)) for EVERY column j
    (cos into both even and odd columns; no sin anywhere)."""
    pos = jnp.arange(seqn_len, dtype=jnp.float32)[:, None]            # (S, 1)
    j = jnp.arange(d_model, dtype=jnp.float32)[None, :]               # (1, D)
    pe = jnp.cos(pos / jnp.power(10000.0, 2.0 * j / float(d_model)))  # (S, D)
    return pe[None, :, :]                                             # (1, S, D)


# --------------------------------------------------------------------------- #
# Kernels
# --------------------------------------------------------------------------- #
def _pe_add_kernel(x_ref, pe_ref, o_ref):
    # x_ref: (bB, G, tC); pe_ref: (1, G, tC) -> broadcasts over the batch dim.
    o_ref[...] = (x_ref[...] + pe_ref[...]).astype(o_ref.dtype)


def _pe_add_dropout_kernel(seed_ref, x_ref, pe_ref, o_ref, *, dropout_p: float):
    val = x_ref[...] + pe_ref[...]
    if dropout_p >= 1.0:
        val = jnp.zeros_like(val)
    else:
        # Each grid step owns a disjoint (batch-tile, column-tile) slab, so a
        # per-step seed offset gives independent streams everywhere (including
        # when the grid is sharded across v7x's two TensorCores).
        step = pl.program_id(0) * pl.num_programs(1) + pl.program_id(1)
        pltpu.prng_seed(seed_ref[0] + step)
        bits = pltpu.bitcast(pltpu.prng_random_bits(val.shape), jnp.uint32)
        thresh = jnp.uint32(min(int(dropout_p * (2.0 ** 32)), 2 ** 32 - 1))
        keep = bits >= thresh
        val = jnp.where(keep, val * (1.0 / (1.0 - dropout_p)),
                        jnp.zeros_like(val))
    o_ref[...] = val.astype(o_ref.dtype)


# --------------------------------------------------------------------------- #
# Block sizing
# --------------------------------------------------------------------------- #
def _per_x_block_target_bytes() -> int:
    """Per-generation x/out block target.  Block dims below are 8/128 aligned,
    so these are real (padding-free) bytes.
      v7x : ~3.2 TB/s HBM, 32 MiB scoped default, 64 MiB physical -> 6 MiB
      v6e : ~1.4 TB/s                                            -> 4 MiB
      v5e : ~0.8 TB/s, 16 MiB scoped default (2 MiB ~= 85% of roofline) -> 2 MiB
    """
    try:
        kind = jax.devices()[0].device_kind.lower()
    except Exception:  # pragma: no cover - conservative default off-TPU
        kind = ""
    if "v7" in kind:
        return 6 * 1024 * 1024
    if "v6" in kind:
        return 4 * 1024 * 1024
    return 2 * 1024 * 1024


# --------------------------------------------------------------------------- #
# Forward
# --------------------------------------------------------------------------- #
def position_encoding_forward(x: jnp.ndarray, pe: jnp.ndarray,
                              dropout_p: float = 0.0, training: bool = False,
                              seed: int = 0) -> jnp.ndarray:
    """x: (B, S, D); pe: (1, seqn_len, D). Returns dropout(x + pe[:, :S, :])."""
    B, S, D = x.shape
    L = S * D
    itemsize = jnp.dtype(x.dtype).itemsize

    # Sublane-dense fold of the (S, D) tail (see header comment).
    G = 8 if L % 8 == 0 else 1           # G=1 fallback keeps correctness for odd L
    C = L // G
    x3 = x.reshape(B, G, C)
    pe3 = pe[:, :S, :].astype(x.dtype).reshape(1, G, C)   # == self.pe[:, :x.shape[1], :]

    target = _per_x_block_target_bytes()

    # Batch tile: whole batch unless even a 128-lane strip of it would exceed
    # the block target (then B gets its own grid axis).
    row_strip_bytes = G * 128 * itemsize
    bB = max(1, min(B, target // max(row_strip_bytes, 1)))

    # Column tile: lane-aligned, sized so the double-buffered x+out+pe working
    # set stays within ~4x the per-chip block target (<= ~24 MiB on v7x).
    if C <= 128:
        tC = C                                              # full extent
    else:
        per_col_bytes = 2 * (2 * bB * G + G) * itemsize     # x+out+pe, 2-buffered
        budget = 4 * target
        tC = (budget // per_col_bytes) // 128 * 128
        tC = max(128, min(tC, (C // 128) * 128))

    grid_b = pl.cdiv(B, bB)
    grid_c = pl.cdiv(C, tC)     # ragged last block is masked by Pallas

    # v7x megacore: split a large single-block case so both TCs get work.
    if grid_b * grid_c == 1 and C > 128 and B * L * itemsize > (1 << 20):
        tC = max(128, -(-((C + 1) // 2) // 128) * 128)      # ~half, 128-aligned
        grid_c = pl.cdiv(C, tC)

    x_block = (bB, G, tC)
    pe_block = (1, G, tC)

    cost = pl.CostEstimate(
        flops=B * L,                                   # one add per element
        transcendentals=0,
        bytes_accessed=(2 * B * L + L) * itemsize,     # x read + out write + pe
    )
    cparams = pltpu.CompilerParams(
        dimension_semantics=("parallel", "parallel"),  # shards across TCs on v7x
        vmem_limit_bytes=32 * 1024 * 1024,
    )
    out_shape = jax.ShapeDtypeStruct((B, G, C), x.dtype)

    if training and dropout_p > 0.0:
        # Fused add + inverted dropout: PRNG mask + scale in the same HBM pass.
        kernel = functools.partial(_pe_add_dropout_kernel,
                                   dropout_p=float(dropout_p))
        seed_arr = jnp.array([seed], dtype=jnp.int32)
        out3 = pl.pallas_call(
            kernel,
            out_shape=out_shape,
            grid_spec=pltpu.PrefetchScalarGridSpec(
                num_scalar_prefetch=1,                 # dropout seed in SMEM
                grid=(grid_b, grid_c),
                in_specs=[
                    pl.BlockSpec(x_block, lambda i, j, seed_r: (i, 0, j)),
                    pl.BlockSpec(pe_block, lambda i, j, seed_r: (0, 0, j)),
                ],
                out_specs=pl.BlockSpec(x_block, lambda i, j, seed_r: (i, 0, j)),
            ),
            compiler_params=cparams,
            cost_estimate=cost,
        )(seed_arr, x3, pe3)
    else:
        # Eval path: trivially mem-bound add; no seed prefetch, no PRNG.
        out3 = pl.pallas_call(
            _pe_add_kernel,
            out_shape=out_shape,
            grid_spec=pl.GridSpec(
                grid=(grid_b, grid_c),
                in_specs=[
                    pl.BlockSpec(x_block, lambda i, j: (i, 0, j)),
                    pl.BlockSpec(pe_block, lambda i, j: (0, 0, j)),
                ],
                out_specs=pl.BlockSpec(x_block, lambda i, j: (i, 0, j)),
            ),
            compiler_params=cparams,
            cost_estimate=cost,
        )(x3, pe3)

    return out3.reshape(B, S, D)


if __name__ == "__main__":
    # Module config (deterministic, synthetic): d_model=32, seqn_len=16, p=0.1
    d_model = 32
    seqn_len = 16
    dropout_p = 0.1

    # Input: batch=2, seq=8 (< seqn_len to exercise the pe slicing), d_model=32
    B, S = 2, 8
    key = jax.random.PRNGKey(0)
    x = jax.random.normal(key, (B, S, d_model), dtype=jnp.float32)

    pe = make_pe_table(seqn_len, d_model)

    # Eval-mode forward (nn.Dropout is identity in eval), exactly the PyTorch
    # module's forward semantics.
    out = position_encoding_forward(x, pe, dropout_p=dropout_p, training=False)
    out = jax.block_until_ready(out)

    # Reference check against plain-JAX semantics of the PyTorch forward (eval).
    ref = x + pe[:, :S, :]
    assert out.shape == (B, S, d_model)
    assert jnp.allclose(out, ref, atol=1e-6, rtol=1e-6), "mismatch vs reference"

    # TODO(synk): hardware-validate the fused-dropout training path separately
    # (keep-rate ~= 1-p and 1/(1-p) scaling); it is implemented above but not
    # exercised here so this self-check stays deterministic.
    print("KERNEL_OK")
</pallas_src>

<mosaic_0001>
module attributes {stable_mosaic.version = 11 : i64} {
  func.func @_pe_add_kernel(%arg0: i32, %arg1: i32, %arg2: memref<2x8x32xf32, #tpu.memory_space<vmem>>, %arg3: memref<1x8x32xf32, #tpu.memory_space<vmem>>, %arg4: memref<2x8x32xf32, #tpu.memory_space<vmem>>) attributes {dimension_semantics = [#tpu.dimension_semantics<parallel>, #tpu.dimension_semantics<parallel>], iteration_bounds = array<i64: 1, 1>, scalar_prefetch = 0 : i64, scratch_operands = 0 : i64, tpu.core_type = #tpu.core_type<tc>, window_params = [{transform_indices = @transform_0, window_bounds = array<i64: 2, 8, 32>}, {transform_indices = @transform_1, window_bounds = array<i64: 1, 8, 32>}, {transform_indices = @transform_2, window_bounds = array<i64: 2, 8, 32>}]} {
    %c0 = arith.constant 0 : index
    %c0_0 = arith.constant 0 : index
    %c0_1 = arith.constant 0 : index
    %0 = vector.load %arg2[%c0, %c0_0, %c0_1] : memref<2x8x32xf32, #tpu.memory_space<vmem>>, vector<2x8x32xf32>
    %c0_2 = arith.constant 0 : index
    %c0_3 = arith.constant 0 : index
    %c0_4 = arith.constant 0 : index
    %1 = vector.load %arg3[%c0_2, %c0_3, %c0_4] : memref<1x8x32xf32, #tpu.memory_space<vmem>>, vector<1x8x32xf32>
    %2 = vector.broadcast %1 : vector<1x8x32xf32> to vector<2x8x32xf32>
    %3 = arith.addf %0, %2 : vector<2x8x32xf32>
    %c0_5 = arith.constant 0 : index
    %c0_6 = arith.constant 0 : index
    %c0_7 = arith.constant 0 : index
    %4 = vector.load %arg4[%c0_5, %c0_6, %c0_7] : memref<2x8x32xf32, #tpu.memory_space<vmem>>, vector<2x8x32xf32>
    tpu.vector_store %arg4[%c0_5, %c0_6, %c0_7], %3 {strides = array<i32>} : memref<2x8x32xf32, #tpu.memory_space<vmem>>, vector<2x8x32xf32>,
    return
  }
  func.func @transform_0(%arg0: i32, %arg1: i32) -> (i32, i32, i32) {
    %c0_i32 = arith.constant 0 : i32
    %c0_i32_0 = arith.constant 0 : i32
    return %arg0, %c0_i32, %arg1 : i32, i32, i32
  }
  func.func @transform_1(%arg0: i32, %arg1: i32) -> (i32, i32, i32) {
    %c0_i32 = arith.constant 0 : i32
    %c0_i32_0 = arith.constant 0 : i32
    %c0_i32_1 = arith.constant 0 : i32
    return %c0_i32, %c0_i32_0, %arg1 : i32, i32, i32
  }
  func.func @transform_2(%arg0: i32, %arg1: i32) -> (i32, i32, i32) {
    %c0_i32 = arith.constant 0 : i32
    %c0_i32_0 = arith.constant 0 : i32
    return %arg0, %c0_i32, %arg1 : i32, i32, i32
  }
}

</mosaic_0001>

<bundles_post_ra>
// kernel: tpu_custom_call.1
= control target key start
LH: loop header
LB: loop body
LE: loop exit
PB: predicated region body
PF: predicated region fallthrough
CT: control target
= control target key end

     0   :  { %7 = vsyncpa [#allocation3], 0  ;;  %s182_s0 = inlined_call_operand.hbm [shape: f32[2,8,32], index: 0, kind: input, shape index: {}]   ;;  %s183_s1 = inlined_call_operand.hbm [shape: f32[1,8,32], index: 1, kind: input, shape index: {}]   ;;  %s184_s2 = inlined_call_operand.hbm [shape: f32[2,8,32], index: 2, kind: output, shape index: {}]  }
   0x1   :  { %8 = vsyncpa [#allocation6], 0 }
   0x2   :  { %9 = vsyncpa [#allocation4], 0  ;;  %s14_s11 = sshll.u32 %s182_s0, 4  ;;  %s153_s12 = smov [#allocation2]   ;;  %s15_s11 = int_to_ptr.hbm [resolvable:$true] %s14_s11 }
   0x3   :  { %s16_s13 = sshll.u32 %s153_s12, 4  ;;  %s28_s16 = sshll.u32 %s183_s1, 4  ;;  %s17_s13 = int_to_ptr.vmem [resolvable:$true] %s16_s13  ;;  %s29_s16 = int_to_ptr.hbm [resolvable:$true] %s28_s16 }
   0x4   :  { %s154_s17 = smov 128   ;;  %s155_s18 = smov 8  }
   0x5   :  { %22 = dma.hbm_to_vmem [thread:$0]  %s15_s11, 256, %s17_s13, [#allocation3], %s154_s17, %s154_s17, %s155_s18  }
   0x6   :  { %s156_s19 = smov [#allocation5]  }
   0x7   :  { %s30_s20 = sshll.u32 %s156_s19, 4  ;;  %s31_s20 = int_to_ptr.vmem [resolvable:$true] %s30_s20 }
   0x8   :  { %33 = dma.hbm_to_vmem [thread:$0]  %s29_s16, 128, %s31_s20, [#allocation6]  }
   0x9   :  { %147 = dma.done.wait [#allocation3], 256  }
   0xa   :  { %148 = vsyncadd [#allocation3], 4294967040 }
   0xb   :  { %149 = dma.done.wait [#allocation6], 128  }
   0xc   :  { %150 = vsyncadd [#allocation6], 4294967168  ;;  %s157_s0 = smov [#allocation7]   ;;  %s56_s24 = sshll.u32 %s184_s2, 4  ;;  %v42_v0 = vld [vmem:[#allocation2] sm:$0xff]  ;;  %v44_v1 = vld [vmem:[#allocation5] sm:$0xff]  ;;  %s57_s24 = int_to_ptr.hbm [resolvable:$true] %s56_s24 }
   0xd   :  { %s54_s21 = sshll.u32 %s157_s0, 4  ;;  %vm47_vm0 = vcmask 261120   ;;  %v43_v2 = vld [vmem:[#allocation2 + $0x8] sm:$0xff]  ;;  %v45_v3 = vadd.f32 %v44_v1, %v42_v0  ;;  %s55_s21 = int_to_ptr.vmem [resolvable:$true] %s54_s21 }
   0xe   :  { %v46_v4 = vadd.f32 %v44_v1, %v43_v2 }
   0xf   :  { %48 = vst.msk [vmem:[#allocation7] sm:$0xff] %vm47_vm0, %v45_v3 }
  0x10   :  { %49 = vst.msk [vmem:[#allocation7 + $0x8] sm:$0xff] %vm47_vm0, %v46_v4 }
  0x11   :  { %62 = dma.vmem_to_hbm [thread:$0]  %s55_s21, 256, %s57_s24, [#allocation4], %s154_s17, %s154_s17, %s155_s18  }
  0x12   :  { %151 = dma.done.wait [#allocation4], 256  }
  0x13   :  { %152 = vsyncadd [#allocation4], 4294967040 }
  0x14   :  { %67 = vsyncpa [#allocation3], 1 }
  0x15   :  { %68 = vsyncpa [#allocation6], 1 }
  0x16   :  { %69 = vsyncpa [#allocation4], 1 }

</bundles_post_ra>
